<compile_context>
chip_gen: v7x
topology: tpu7x:2x2x1
jax: 0.10.0
libtpu: 0.0.40
codegen_flags: <defaults>
</compile_context>

<pallas_src>
import jax
import jax.numpy as jnp
from jax import lax
from jax.experimental import pallas as pl
from jax.experimental.pallas import tpu as pltpu


def ehr_memory_kernel(x_ref, mask_ref, init_ref, wea_ref, bea_ref,
                      out_ref, e_sc, a_sc):
    # x_ref    : (T, rows, word_dim)   rows = (batch-in-chunk * 12), sublane-aligned
    # mask_ref : (T, rows, 1)
    # init_ref : (rows, mem_dim)
    # wea_ref  : (word_dim, 2*mem_dim)   fused [W_erase || W_add]
    # bea_ref  : (1, 2*mem_dim)          fused [b_erase || b_add]
    # out_ref  : (rows, mem_dim)
    # e_sc/a_sc: (T, rows, mem_dim) VMEM scratch (masked erase / add slabs)
    t_steps, rows, word_dim = x_ref.shape
    mem_dim = out_ref.shape[-1]

    # ---- Hoisted, fused gating projection: one lane-dense 2D MXU matmul ----
    x2d = x_ref[...].reshape(t_steps * rows, word_dim)          # rows % 8 == 0
    proj = jnp.dot(x2d, wea_ref[...],
                   preferred_element_type=jnp.float32) + bea_ref[...]
    proj = proj.reshape(t_steps, rows, 2 * mem_dim)

    # Activations + mask applied to the whole slab (off the sequential path).
    m = mask_ref[...]                                            # (T, rows, 1)
    e_sc[...] = jax.nn.sigmoid(proj[:, :, :mem_dim]) * m
    a_sc[...] = jnp.tanh(proj[:, :, mem_dim:]) * m

    # ---- Sequential memory recurrence: pure elementwise VPU scan ----
    def step(t, mem):
        # Leading-dim dynamic index on the scratch refs: cheap addressed load.
        return mem * (1.0 - e_sc[t]) + a_sc[t]

    mem = lax.fori_loop(0, t_steps, step, init_ref[...],
                        unroll=(t_steps <= 32))
    out_ref[...] = mem


def ehr_memory_forward(x, demo, mask, params, *,
                       num_batch_blocks=1, use_bf16_matmul=False):
    """Forward pass matching EHRMemoryNetwork. Returns (B, 13, mem_dim)."""
    B, T, twelve, word_dim = x.shape
    assert twelve == 12
    mem_dim = params["init_memory"].shape[1]

    assert B % num_batch_blocks == 0
    nb = num_batch_blocks
    bc = B // nb                       # batches per grid block
    bc12 = bc * 12                     # rows per grid block (before padding)
    bc12p = -(-bc12 // 8) * 8          # pad rows per block to sublane multiple
    pad = bc12p - bc12

    # ---- One-time layout prep in plain JAX (outside the sequential kernel) ----
    # Rows ordered (t, block, batch-in-block, slot): time-major so each step's
    # rows form one contiguous, aligned slab.
    x_rows = jnp.transpose(x, (1, 0, 2, 3)).reshape(T, nb, bc12, word_dim)
    mask_rows = jnp.broadcast_to(mask.T[:, :, None],
                                 (T, B, 12)).reshape(T, nb, bc12, 1)
    init_rows = jnp.tile(params["init_memory"], (B, 1)).reshape(nb, bc12, mem_dim)
    if pad:
        # Zero-padded rows have mask 0 -> erase = add = 0 -> inert; sliced off below.
        x_rows = jnp.pad(x_rows, ((0, 0), (0, 0), (0, pad), (0, 0)))
        mask_rows = jnp.pad(mask_rows, ((0, 0), (0, 0), (0, pad), (0, 0)))
        init_rows = jnp.pad(init_rows, ((0, 0), (0, pad), (0, 0)))
    x_rows = x_rows.reshape(T, nb * bc12p, word_dim)
    mask_rows = mask_rows.reshape(T, nb * bc12p, 1).astype(jnp.float32)
    init_rows = init_rows.reshape(nb * bc12p, mem_dim).astype(jnp.float32)

    # Fused erase||add projection weights: halves MXU issues, doubles lane fill.
    w_ea = jnp.concatenate([params["W_erase"], params["W_add"]], axis=1)
    b_ea = jnp.concatenate([params["b_erase"], params["b_add"]],
                           axis=1).astype(jnp.float32)
    if use_bf16_matmul:   # v6e/v7x MXU fast path; f32 accumulation kept in-kernel
        x_rows = x_rows.astype(jnp.bfloat16)
        w_ea = w_ea.astype(jnp.bfloat16)
    else:
        x_rows = x_rows.astype(jnp.float32)
        w_ea = w_ea.astype(jnp.float32)

    in_specs = [
        pl.BlockSpec((T, bc12p, word_dim), lambda b: (0, b, 0)),   # x (time-major rows)
        pl.BlockSpec((T, bc12p, 1), lambda b: (0, b, 0)),          # row-expanded mask
        pl.BlockSpec((bc12p, mem_dim), lambda b: (b, 0)),          # tiled init memory
        pl.BlockSpec((word_dim, 2 * mem_dim), lambda b: (0, 0)),   # fused W
        pl.BlockSpec((1, 2 * mem_dim), lambda b: (0, 0)),          # fused b
    ]
    out_specs = pl.BlockSpec((bc12p, mem_dim), lambda b: (b, 0))

    mem_flat = pl.pallas_call(
        ehr_memory_kernel,
        out_shape=jax.ShapeDtypeStruct((nb * bc12p, mem_dim), jnp.float32),
        grid_spec=pltpu.PrefetchScalarGridSpec(
            num_scalar_prefetch=0,
            grid=(nb,),
            in_specs=in_specs,
            out_specs=out_specs,
            scratch_shapes=[
                pltpu.VMEM((T, bc12p, mem_dim), jnp.float32),
                pltpu.VMEM((T, bc12p, mem_dim), jnp.float32),
            ],
        ),
        compiler_params=pltpu.CompilerParams(
            # Batch chunks are independent -> "parallel" (v7x megacore split).
            dimension_semantics=("parallel",)),
    )(x_rows, mask_rows, init_rows, w_ea, b_ea)

    memory = mem_flat.reshape(nb, bc12p, mem_dim)[:, :bc12].reshape(B, 12, mem_dim)

    # Demo embedding is independent of the recurrence -> thin JAX wrapper
    # (per perf review: keeps the kernel output lane-dense / no partial stores).
    demo_mem = jnp.tanh(demo @ params["W_demo"] + params["b_demo"])
    return jnp.concatenate([memory, demo_mem[:, None, :]], axis=1)


def ehr_memory_reference(x, demo, mask, params):
    """Plain-JAX reference matching the PyTorch forward semantics."""
    B, T, _, _ = x.shape
    mem_dim = params["init_memory"].shape[1]
    memory = jnp.broadcast_to(params["init_memory"][None], (B, 12, mem_dim))
    demo_mem = jnp.tanh(demo @ params["W_demo"] + params["b_demo"])
    for i in range(T):
        cur = x[:, i]                                    # (B, 12, word_dim)
        erase = jax.nn.sigmoid(cur @ params["W_erase"] + params["b_erase"])
        add = jnp.tanh(cur @ params["W_add"] + params["b_add"])
        cur_mask = mask[:, i].reshape(B, 1, 1)
        erase = erase * cur_mask
        add = add * cur_mask
        memory = memory * (1.0 - erase) + add
    return jnp.concatenate([memory, demo_mem[:, None, :]], axis=1)


def make_params(key, word_dim, mem_dim, demo_dim):
    ks = jax.random.split(key, 7)
    scale = 0.1
    return {
        "W_erase": scale * jax.random.normal(ks[0], (word_dim, mem_dim), jnp.float32),
        "b_erase": scale * jax.random.normal(ks[1], (1, mem_dim), jnp.float32),
        "W_add":   scale * jax.random.normal(ks[2], (word_dim, mem_dim), jnp.float32),
        "b_add":   scale * jax.random.normal(ks[3], (1, mem_dim), jnp.float32),
        "W_demo":  scale * jax.random.normal(ks[4], (demo_dim, mem_dim), jnp.float32),
        "b_demo":  scale * jax.random.normal(ks[5], (1, mem_dim), jnp.float32),
        "init_memory": jax.random.normal(ks[6], (12, mem_dim), jnp.float32),
    }


if __name__ == "__main__":
    B, T, word_dim, mem_dim, demo_dim = 2, 8, 16, 32, 8

    key = jax.random.PRNGKey(0)
    k_x, k_d, k_m, k_p = jax.random.split(key, 4)

    x = jax.random.normal(k_x, (B, T, 12, word_dim), jnp.float32)
    demo = jax.random.normal(k_d, (B, demo_dim), jnp.float32)
    mask = (jax.random.uniform(k_m, (B, T)) > 0.3).astype(jnp.float32)
    params = make_params(k_p, word_dim, mem_dim, demo_dim)

    ref = ehr_memory_reference(x, demo, mask, params)

    # Default: single batch chunk (works for any B; v5e/v6e).
    out = jax.block_until_ready(ehr_memory_forward(x, demo, mask, params))
    assert out.shape == (B, 13, mem_dim)
    assert jnp.allclose(out, ref, atol=1e-4, rtol=1e-4), "mismatch vs reference"

    # v7x-style batch-parallel path (2 chunks -> 2 TensorCores), same numerics.
    out2 = jax.block_until_ready(
        ehr_memory_forward(x, demo, mask, params, num_batch_blocks=2))
    assert jnp.allclose(out2, ref, atol=1e-4, rtol=1e-4), "mismatch (batch-parallel)"

    print("KERNEL_OK")
</pallas_src>

<mosaic_0001>
module attributes {stable_mosaic.version = 11 : i64} {
  func.func @ehr_memory_kernel(%arg0: i32, %arg1: memref<8x24x16xf32, #tpu.memory_space<vmem>>, %arg2: memref<8x24x1xf32, #tpu.memory_space<vmem>>, %arg3: memref<24x32xf32, #tpu.memory_space<vmem>>, %arg4: memref<16x64xf32, #tpu.memory_space<vmem>>, %arg5: memref<1x64xf32, #tpu.memory_space<vmem>>, %arg6: memref<24x32xf32, #tpu.memory_space<vmem>>, %arg7: memref<8x24x32xf32, #tpu.memory_space<vmem>>, %arg8: memref<8x24x32xf32, #tpu.memory_space<vmem>>) attributes {dimension_semantics = [#tpu.dimension_semantics<parallel>], iteration_bounds = array<i64: 1>, scalar_prefetch = 0 : i64, scratch_operands = 2 : i64, tpu.core_type = #tpu.core_type<tc>, window_params = [{transform_indices = @transform_0, window_bounds = array<i64: 8, 24, 16>}, {transform_indices = @transform_1, window_bounds = array<i64: 8, 24, 1>}, {transform_indices = @transform_2, window_bounds = array<i64: 24, 32>}, {pipeline_mode = #tpu.pipeline_mode<synchronous>, transform_indices = @transform_3, window_bounds = array<i64: 16, 64>}, {pipeline_mode = #tpu.pipeline_mode<synchronous>, transform_indices = @transform_4, window_bounds = array<i64: 1, 64>}, {transform_indices = @transform_5, window_bounds = array<i64: 24, 32>}]} {
    %c0 = arith.constant 0 : index
    %c0_0 = arith.constant 0 : index
    %c0_1 = arith.constant 0 : index
    %0 = vector.load %arg1[%c0, %c0_0, %c0_1] : memref<8x24x16xf32, #tpu.memory_space<vmem>>, vector<8x24x16xf32>
    %1 = vector.shape_cast %0 : vector<8x24x16xf32> to vector<192x16xf32>
    %c0_2 = arith.constant 0 : index
    %c0_3 = arith.constant 0 : index
    %2 = vector.load %arg4[%c0_2, %c0_3] : memref<16x64xf32, #tpu.memory_space<vmem>>, vector<16x64xf32>
    %cst = arith.constant dense<0.000000e+00> : vector<192x64xf32>
    %3 = tpu.matmul %1, %2, %cst {dimension_numbers = #tpu.dot_dimension_numbers<[1], [0], [0], [1], [0, 0, 1, 1], [], []>} : vector<192x16xf32>, vector<16x64xf32>, vector<192x64xf32> -> vector<192x64xf32>
    %c0_4 = arith.constant 0 : index
    %c0_5 = arith.constant 0 : index
    %4 = vector.load %arg5[%c0_4, %c0_5] : memref<1x64xf32, #tpu.memory_space<vmem>>, vector<1x64xf32>
    %5 = vector.broadcast %4 : vector<1x64xf32> to vector<192x64xf32>
    %6 = arith.addf %3, %5 : vector<192x64xf32>
    %7 = vector.shape_cast %6 : vector<192x64xf32> to vector<8x24x64xf32>
    %c0_6 = arith.constant 0 : index
    %c0_7 = arith.constant 0 : index
    %c0_8 = arith.constant 0 : index
    %8 = vector.load %arg2[%c0_6, %c0_7, %c0_8] : memref<8x24x1xf32, #tpu.memory_space<vmem>>, vector<8x24x1xf32>
    %9 = vector.extract_strided_slice %7 {offsets = [0, 0, 0], sizes = [8, 24, 32], strides = [1, 1, 1]} : vector<8x24x64xf32> to vector<8x24x32xf32>
    %10 = arith.negf %9 : vector<8x24x32xf32>
    %11 = math.exp %10 : vector<8x24x32xf32>
    %cst_9 = arith.constant 1.000000e+00 : f32
    %12 = vector.broadcast %cst_9 : f32 to vector<8x24x32xf32>
    %13 = arith.addf %12, %11 : vector<8x24x32xf32>
    %14 = arith.divf %12, %13 : vector<8x24x32xf32>
    %15 = vector.broadcast %8 : vector<8x24x1xf32> to vector<8x24x32xf32>
    %16 = arith.mulf %14, %15 : vector<8x24x32xf32>
    %c0_10 = arith.constant 0 : index
    %c0_11 = arith.constant 0 : index
    %c0_12 = arith.constant 0 : index
    %17 = vector.load %arg7[%c0_10, %c0_11, %c0_12] : memref<8x24x32xf32, #tpu.memory_space<vmem>>, vector<8x24x32xf32>
    tpu.vector_store %arg7[%c0_10, %c0_11, %c0_12], %16 {strides = array<i32>} : memref<8x24x32xf32, #tpu.memory_space<vmem>>, vector<8x24x32xf32>,
    %18 = vector.extract_strided_slice %7 {offsets = [0, 0, 32], sizes = [8, 24, 32], strides = [1, 1, 1]} : vector<8x24x64xf32> to vector<8x24x32xf32>
    %19 = math.tanh %18 : vector<8x24x32xf32>
    %20 = vector.broadcast %8 : vector<8x24x1xf32> to vector<8x24x32xf32>
    %21 = arith.mulf %19, %20 : vector<8x24x32xf32>
    %c0_13 = arith.constant 0 : index
    %c0_14 = arith.constant 0 : index
    %c0_15 = arith.constant 0 : index
    %22 = vector.load %arg8[%c0_13, %c0_14, %c0_15] : memref<8x24x32xf32, #tpu.memory_space<vmem>>, vector<8x24x32xf32>
    tpu.vector_store %arg8[%c0_13, %c0_14, %c0_15], %21 {strides = array<i32>} : memref<8x24x32xf32, #tpu.memory_space<vmem>>, vector<8x24x32xf32>,
    %c0_16 = arith.constant 0 : index
    %c0_17 = arith.constant 0 : index
    %23 = vector.load %arg3[%c0_16, %c0_17] : memref<24x32xf32, #tpu.memory_space<vmem>>, vector<24x32xf32>
    %c0_i32 = arith.constant 0 : i32
    %24 = arith.index_cast %c0_i32 : i32 to index
    %c0_18 = arith.constant 0 : index
    %c0_19 = arith.constant 0 : index
    %25 = vector.load %arg7[%24, %c0_18, %c0_19] : memref<8x24x32xf32, #tpu.memory_space<vmem>>, vector<1x24x32xf32>
    %26 = vector.shape_cast %25 : vector<1x24x32xf32> to vector<24x32xf32>
    %cst_20 = arith.constant 1.000000e+00 : f32
    %27 = vector.broadcast %cst_20 : f32 to vector<24x32xf32>
    %28 = arith.subf %27, %26 : vector<24x32xf32>
    %29 = arith.mulf %23, %28 : vector<24x32xf32>
    %30 = arith.index_cast %c0_i32 : i32 to index
    %c0_21 = arith.constant 0 : index
    %c0_22 = arith.constant 0 : index
    %31 = vector.load %arg8[%30, %c0_21, %c0_22] : memref<8x24x32xf32, #tpu.memory_space<vmem>>, vector<1x24x32xf32>
    %32 = vector.shape_cast %31 : vector<1x24x32xf32> to vector<24x32xf32>
    %33 = arith.addf %29, %32 : vector<24x32xf32>
    %c1_i32 = arith.constant 1 : i32
    %34 = arith.index_cast %c1_i32 : i32 to index
    %c0_23 = arith.constant 0 : index
    %c0_24 = arith.constant 0 : index
    %35 = vector.load %arg7[%34, %c0_23, %c0_24] : memref<8x24x32xf32, #tpu.memory_space<vmem>>, vector<1x24x32xf32>
    %36 = vector.shape_cast %35 : vector<1x24x32xf32> to vector<24x32xf32>
    %cst_25 = arith.constant 1.000000e+00 : f32
    %37 = vector.broadcast %cst_25 : f32 to vector<24x32xf32>
    %38 = arith.subf %37, %36 : vector<24x32xf32>
    %39 = arith.mulf %33, %38 : vector<24x32xf32>
    %40 = arith.index_cast %c1_i32 : i32 to index
    %c0_26 = arith.constant 0 : index
    %c0_27 = arith.constant 0 : index
    %41 = vector.load %arg8[%40, %c0_26, %c0_27] : memref<8x24x32xf32, #tpu.memory_space<vmem>>, vector<1x24x32xf32>
    %42 = vector.shape_cast %41 : vector<1x24x32xf32> to vector<24x32xf32>
    %43 = arith.addf %39, %42 : vector<24x32xf32>
    %c2_i32 = arith.constant 2 : i32
    %44 = arith.index_cast %c2_i32 : i32 to index
    %c0_28 = arith.constant 0 : index
    %c0_29 = arith.constant 0 : index
    %45 = vector.load %arg7[%44, %c0_28, %c0_29] : memref<8x24x32xf32, #tpu.memory_space<vmem>>, vector<1x24x32xf32>
    %46 = vector.shape_cast %45 : vector<1x24x32xf32> to vector<24x32xf32>
    %cst_30 = arith.constant 1.000000e+00 : f32
    %47 = vector.broadcast %cst_30 : f32 to vector<24x32xf32>
    %48 = arith.subf %47, %46 : vector<24x32xf32>
    %49 = arith.mulf %43, %48 : vector<24x32xf32>
    %50 = arith.index_cast %c2_i32 : i32 to index
    %c0_31 = arith.constant 0 : index
    %c0_32 = arith.constant 0 : index
    %51 = vector.load %arg8[%50, %c0_31, %c0_32] : memref<8x24x32xf32, #tpu.memory_space<vmem>>, vector<1x24x32xf32>
    %52 = vector.shape_cast %51 : vector<1x24x32xf32> to vector<24x32xf32>
    %53 = arith.addf %49, %52 : vector<24x32xf32>
    %c3_i32 = arith.constant 3 : i32
    %54 = arith.index_cast %c3_i32 : i32 to index
    %c0_33 = arith.constant 0 : index
    %c0_34 = arith.constant 0 : index
    %55 = vector.load %arg7[%54, %c0_33, %c0_34] : memref<8x24x32xf32, #tpu.memory_space<vmem>>, vector<1x24x32xf32>
    %56 = vector.shape_cast %55 : vector<1x24x32xf32> to vector<24x32xf32>
    %cst_35 = arith.constant 1.000000e+00 : f32
    %57 = vector.broadcast %cst_35 : f32 to vector<24x32xf32>
    %58 = arith.subf %57, %56 : vector<24x32xf32>
    %59 = arith.mulf %53, %58 : vector<24x32xf32>
    %60 = arith.index_cast %c3_i32 : i32 to index
    %c0_36 = arith.constant 0 : index
    %c0_37 = arith.constant 0 : index
    %61 = vector.load %arg8[%60, %c0_36, %c0_37] : memref<8x24x32xf32, #tpu.memory_space<vmem>>, vector<1x24x32xf32>
    %62 = vector.shape_cast %61 : vector<1x24x32xf32> to vector<24x32xf32>
    %63 = arith.addf %59, %62 : vector<24x32xf32>
    %c4_i32 = arith.constant 4 : i32
    %64 = arith.index_cast %c4_i32 : i32 to index
    %c0_38 = arith.constant 0 : index
    %c0_39 = arith.constant 0 : index
    %65 = vector.load %arg7[%64, %c0_38, %c0_39] : memref<8x24x32xf32, #tpu.memory_space<vmem>>, vector<1x24x32xf32>
    %66 = vector.shape_cast %65 : vector<1x24x32xf32> to vector<24x32xf32>
    %cst_40 = arith.constant 1.000000e+00 : f32
    %67 = vector.broadcast %cst_40 : f32 to vector<24x32xf32>
    %68 = arith.subf %67, %66 : vector<24x32xf32>
    %69 = arith.mulf %63, %68 : vector<24x32xf32>
    %70 = arith.index_cast %c4_i32 : i32 to index
    %c0_41 = arith.constant 0 : index
    %c0_42 = arith.constant 0 : index
    %71 = vector.load %arg8[%70, %c0_41, %c0_42] : memref<8x24x32xf32, #tpu.memory_space<vmem>>, vector<1x24x32xf32>
    %72 = vector.shape_cast %71 : vector<1x24x32xf32> to vector<24x32xf32>
    %73 = arith.addf %69, %72 : vector<24x32xf32>
    %c5_i32 = arith.constant 5 : i32
    %74 = arith.index_cast %c5_i32 : i32 to index
    %c0_43 = arith.constant 0 : index
    %c0_44 = arith.constant 0 : index
    %75 = vector.load %arg7[%74, %c0_43, %c0_44] : memref<8x24x32xf32, #tpu.memory_space<vmem>>, vector<1x24x32xf32>
    %76 = vector.shape_cast %75 : vector<1x24x32xf32> to vector<24x32xf32>
    %cst_45 = arith.constant 1.000000e+00 : f32
    %77 = vector.broadcast %cst_45 : f32 to vector<24x32xf32>
    %78 = arith.subf %77, %76 : vector<24x32xf32>
    %79 = arith.mulf %73, %78 : vector<24x32xf32>
    %80 = arith.index_cast %c5_i32 : i32 to index
    %c0_46 = arith.constant 0 : index
    %c0_47 = arith.constant 0 : index
    %81 = vector.load %arg8[%80, %c0_46, %c0_47] : memref<8x24x32xf32, #tpu.memory_space<vmem>>, vector<1x24x32xf32>
    %82 = vector.shape_cast %81 : vector<1x24x32xf32> to vector<24x32xf32>
    %83 = arith.addf %79, %82 : vector<24x32xf32>
    %c6_i32 = arith.constant 6 : i32
    %84 = arith.index_cast %c6_i32 : i32 to index
    %c0_48 = arith.constant 0 : index
    %c0_49 = arith.constant 0 : index
    %85 = vector.load %arg7[%84, %c0_48, %c0_49] : memref<8x24x32xf32, #tpu.memory_space<vmem>>, vector<1x24x32xf32>
    %86 = vector.shape_cast %85 : vector<1x24x32xf32> to vector<24x32xf32>
    %cst_50 = arith.constant 1.000000e+00 : f32
    %87 = vector.broadcast %cst_50 : f32 to vector<24x32xf32>
    %88 = arith.subf %87, %86 : vector<24x32xf32>
    %89 = arith.mulf %83, %88 : vector<24x32xf32>
    %90 = arith.index_cast %c6_i32 : i32 to index
    %c0_51 = arith.constant 0 : index
    %c0_52 = arith.constant 0 : index
    %91 = vector.load %arg8[%90, %c0_51, %c0_52] : memref<8x24x32xf32, #tpu.memory_space<vmem>>, vector<1x24x32xf32>
    %92 = vector.shape_cast %91 : vector<1x24x32xf32> to vector<24x32xf32>
    %93 = arith.addf %89, %92 : vector<24x32xf32>
    %c7_i32 = arith.constant 7 : i32
    %94 = arith.index_cast %c7_i32 : i32 to index
    %c0_53 = arith.constant 0 : index
    %c0_54 = arith.constant 0 : index
    %95 = vector.load %arg7[%94, %c0_53, %c0_54] : memref<8x24x32xf32, #tpu.memory_space<vmem>>, vector<1x24x32xf32>
    %96 = vector.shape_cast %95 : vector<1x24x32xf32> to vector<24x32xf32>
    %cst_55 = arith.constant 1.000000e+00 : f32
    %97 = vector.broadcast %cst_55 : f32 to vector<24x32xf32>
    %98 = arith.subf %97, %96 : vector<24x32xf32>
    %99 = arith.mulf %93, %98 : vector<24x32xf32>
    %100 = arith.index_cast %c7_i32 : i32 to index
    %c0_56 = arith.constant 0 : index
    %c0_57 = arith.constant 0 : index
    %101 = vector.load %arg8[%100, %c0_56, %c0_57] : memref<8x24x32xf32, #tpu.memory_space<vmem>>, vector<1x24x32xf32>
    %102 = vector.shape_cast %101 : vector<1x24x32xf32> to vector<24x32xf32>
    %103 = arith.addf %99, %102 : vector<24x32xf32>
    %c8_i32 = arith.constant 8 : i32
    %c0_58 = arith.constant 0 : index
    %c0_59 = arith.constant 0 : index
    %104 = vector.load %arg6[%c0_58, %c0_59] : memref<24x32xf32, #tpu.memory_space<vmem>>, vector<24x32xf32>
    tpu.vector_store %arg6[%c0_58, %c0_59], %103 {strides = array<i32>} : memref<24x32xf32, #tpu.memory_space<vmem>>, vector<24x32xf32>,
    return
  }
  func.func @transform_0(%arg0: i32) -> (i32, i32, i32) {
    %c0_i32 = arith.constant 0 : i32
    %c0_i32_0 = arith.constant 0 : i32
    %c0_i32_1 = arith.constant 0 : i32
    return %c0_i32, %arg0, %c0_i32_0 : i32, i32, i32
  }
  func.func @transform_1(%arg0: i32) -> (i32, i32, i32) {
    %c0_i32 = arith.constant 0 : i32
    %c0_i32_0 = arith.constant 0 : i32
    %c0_i32_1 = arith.constant 0 : i32
    return %c0_i32, %arg0, %c0_i32_0 : i32, i32, i32
  }
  func.func @transform_2(%arg0: i32) -> (i32, i32) {
    %c0_i32 = arith.constant 0 : i32
    %c0_i32_0 = arith.constant 0 : i32
    return %arg0, %c0_i32 : i32, i32
  }
  func.func @transform_3(%arg0: i32) -> (i32, i32) {
    %c0_i32 = arith.constant 0 : i32
    %c0_i32_0 = arith.constant 0 : i32
    %c0_i32_1 = arith.constant 0 : i32
    return %c0_i32, %c0_i32_0 : i32, i32
  }
  func.func @transform_4(%arg0: i32) -> (i32, i32) {
    %c0_i32 = arith.constant 0 : i32
    %c0_i32_0 = arith.constant 0 : i32
    %c0_i32_1 = arith.constant 0 : i32
    return %c0_i32, %c0_i32_0 : i32, i32
  }
  func.func @transform_5(%arg0: i32) -> (i32, i32) {
    %c0_i32 = arith.constant 0 : i32
    %c0_i32_0 = arith.constant 0 : i32
    return %arg0, %c0_i32 : i32, i32
  }
}

</mosaic_0001>

<bundles_post_ra>
// kernel: tpu_custom_call.1
= control target key start
LH: loop header
LB: loop body
LE: loop exit
PB: predicated region body
PF: predicated region fallthrough
CT: control target
= control target key end

     0   :  { %vm54_vm0 = vcmask 130048   ;;  %v1269_v5 = vmov 0   ;;  %s1742_s0 = inlined_call_operand.vmem [shape: f32[8,24,16], index: 0, kind: input, shape index: {}]   ;;  %s1743_s1 = inlined_call_operand.vmem [shape: f32[8,24,1], index: 1, kind: input, shape index: {}]   ;;  %s1744_s2 = inlined_call_operand.vmem [shape: f32[24,32], index: 2, kind: input, shape index: {}]   ;;  %s1745_s3 = inlined_call_operand.vmem [shape: f32[16,64], index: 3, kind: input, shape index: {}]   ;;  %s1746_s4 = inlined_call_operand.vmem [shape: f32[1,64], index: 4, kind: input, shape index: {}]   ;;  %s1747_s5 = inlined_call_operand.hbm [shape: f32[24,32], index: 5, kind: output, shape index: {}]  }
   0x1   :  { %v45_v0 = vld [vmem:[%s1745_s3] sm:$0xff]  ;;  %v46_v1 = vld [vmem:[%s1745_s3 + $0x8] sm:$0xff]  ;;  %1100 = vset.pattern.permute.xlu1 %v1269_v5  ;;  %1099 = vset.pattern.permute.xlu0 %v1269_v5  ;;  %v23_v8 = vld [vmem:[%s1742_s0 + $0x10] sm:$0xff] }
   0x2   :  { %v21_v2 = vld [vmem:[%s1742_s0] sm:$0xff]  ;;  %v1088_v3 = vpack.c.bf16 %v46_v1, %v45_v0  ;;  %v22_v6 = vld [vmem:[%s1742_s0 + $0x8] sm:$0xff]  ;;  %v35_v9 = vld [vmem:[%s1742_s0 + $0x70] sm:$0xff] }
   0x3   :  { %1052 = vmatprep.mubr.msk.f32.mxu0 %vm54_vm0, %v21_v2  ;;  %v33_v4 = vld [vmem:[%s1742_s0 + $0x60] sm:$0xff]  ;;  %v34_v7 = vld [vmem:[%s1742_s0 + $0x68] sm:$0xff]  ;;  %v24_v10 = vld [vmem:[%s1742_s0 + $0x18] sm:$0xff] }
   0x4   :  { %1070 = vmatprep.mubr.msk.f32.mxu1 %vm54_vm0, %v33_v4  ;;  %1089 = vmatprep.subr.bf16.mxu0 %v1088_v3  ;;  %v36_v11 = vld [vmem:[%s1742_s0 + $0x78] sm:$0xff]  ;;  %v314_v12 = vld [vmem:[%s1743_s1 + $0x10] sm:$0xff]  ;;  %v25_v13 = vld [vmem:[%s1742_s0 + $0x20] sm:$0xff] }
   0x5   :  { %1092 = vmatprep.subr.bf16.mxu1 %v1088_v3  ;;  %1091 = vmatpush3.bf16.msra.mxu0 %v1088_v3  ;;  %v37_v14 = vld [vmem:[%s1742_s0 + $0x80] sm:$0xff]  ;;  %v315_v16 = vld [vmem:[%s1743_s1 + $0x18] sm:$0xff]  ;;  %v313_v17 = vld [vmem:[%s1743_s1 + $0x8] sm:$0xff] }
   0x6   :  { %1093 = vmatpush3.bf16.msra.mxu1 %v1088_v3  ;;  %492 = vperm.xlu1 %1100, %v314_v12   ;;  %v312_v15 = vld [vmem:[%s1743_s1] sm:$0xff]  ;;  %v26_v18 = vld [vmem:[%s1742_s0 + $0x28] sm:$0xff]  ;;  %v27_v20 = vld [vmem:[%s1742_s0 + $0x30] sm:$0xff] }
   0x7   :  { %482 = vperm.xlu0 %1099, %v312_v15   ;;  %v38_v19 = vld [vmem:[%s1742_s0 + $0x88] sm:$0xff]  ;;  %v39_v21 = vld [vmem:[%s1742_s0 + $0x90] sm:$0xff]  ;;  %v316_v23 = vld [vmem:[%s1743_s1 + $0x20] sm:$0xff] }
   0x8   :  { %1053 = vmatmul.mubr.msk.f32.vlgmr.msra.gmra.mrb[0].mxu0 %vm54_vm0, %v22_v6  ;;  %v317_v22 = vld [vmem:[%s1743_s1 + $0x28] sm:$0xff]  ;;  %v28_v24 = vld [vmem:[%s1742_s0 + $0x38] sm:$0xff] }
   0x9   :  { %1071 = vmatmul.mubr.msk.f32.vlgmr.msra.gmra.mrb[0].mxu1 %vm54_vm0, %v34_v7  ;;  %1055 = vmatprep.mubr.msk.f32.mxu0 %vm54_vm0, %v23_v8  ;;  %v40_v25 = vld [vmem:[%s1742_s0 + $0x98] sm:$0xff] }
   0xa   :  { %1073 = vmatprep.mubr.msk.f32.mxu1 %vm54_vm0, %v35_v9  ;;  %497 = vperm.xlu1 %1100, %v315_v16  }
   0xb   :  { %487 = vperm.xlu0 %1099, %v313_v17  }
   0xc   :  { %1056 = vmatmul.mubr.msk.f32.gmra.mrb[2].mxu0 %vm54_vm0, %v24_v10 }
   0xd   :  { %1074 = vmatmul.mubr.msk.f32.gmra.mrb[2].mxu1 %vm54_vm0, %v36_v11  ;;  %1058 = vmatprep.mubr.msk.f32.mxu0 %vm54_vm0, %v25_v13 }
   0xe   :  { %1076 = vmatprep.mubr.msk.f32.mxu1 %vm54_vm0, %v37_v14 }
  0x10   :  { %1059 = vmatmul.mubr.msk.f32.gmra.mrb[4].mxu0 %vm54_vm0, %v26_v18 }
  0x11   :  { %1077 = vmatmul.mubr.msk.f32.gmra.mrb[4].mxu1 %vm54_vm0, %v38_v19  ;;  %1061 = vmatprep.mubr.msk.f32.mxu0 %vm54_vm0, %v27_v20 }
  0x12   :  { %1079 = vmatprep.mubr.msk.f32.mxu1 %vm54_vm0, %v39_v21 }
  0x13   :  { %10 = vsyncpa [#allocation5], 0  ;;  %v29_v26 = vld [vmem:[%s1742_s0 + $0x40] sm:$0xff]  ;;  %507 = vperm.xlu1 %1100, %v317_v22   ;;  %502 = vperm.xlu0 %1099, %v316_v23   ;;  %v319_v28 = vld [vmem:[%s1743_s1 + $0x38] sm:$0xff]  ;;  %vm624_vm1 = vcmask 261120  }
  0x14   :  { %v41_v27 = vld [vmem:[%s1742_s0 + $0xa0] sm:$0xff]  ;;  %1062 = vmatmul.mubr.msk.f32.gmra.mrb[6].mxu0 %vm54_vm0, %v28_v24  ;;  %v318_v29 = vld [vmem:[%s1743_s1 + $0x30] sm:$0xff]  ;;  %v30_v30 = vld [vmem:[%s1742_s0 + $0x48] sm:$0xff] }
  0x15   :  { %1080 = vmatmul.mubr.msk.f32.gmra.mrb[6].mxu1 %vm54_vm0, %v40_v25  ;;  %1064 = vmatprep.mubr.msk.f32.mxu0 %vm54_vm0, %v29_v26  ;;  %v42_v31 = vld [vmem:[%s1742_s0 + $0xa8] sm:$0xff]  ;;  %v31_v32 = vld [vmem:[%s1742_s0 + $0x50] sm:$0xff]  ;;  %v320_v35 = vld [vmem:[%s1743_s1 + $0x40] sm:$0xff] }
  0x16   :  { %1082 = vmatprep.mubr.msk.f32.mxu1 %vm54_vm0, %v41_v27  ;;  %v43_v33 = vld [vmem:[%s1742_s0 + $0xb0] sm:$0xff]  ;;  %v321_v34 = vld [vmem:[%s1743_s1 + $0x48] sm:$0xff]  ;;  %v32_v36 = vld [vmem:[%s1742_s0 + $0x58] sm:$0xff] }
  0x17   :  { %517 = vperm.xlu1 %1100, %v319_v28   ;;  %512 = vperm.xlu0 %1099, %v318_v29   ;;  %v44_v37 = vld [vmem:[%s1742_s0 + $0xb8] sm:$0xff]  ;;  %v322_v39 = vld [vmem:[%s1743_s1 + $0x50] sm:$0xff]  ;;  %v325_v40 = vld [vmem:[%s1743_s1 + $0x68] sm:$0xff] }
  0x18   :  { %1065 = vmatmul.mubr.msk.f32.gmra.mrb[8].mxu0 %vm54_vm0, %v30_v30  ;;  %v323_v38 = vld [vmem:[%s1743_s1 + $0x58] sm:$0xff]  ;;  %v324_v41 = vld [vmem:[%s1743_s1 + $0x60] sm:$0xff]  ;;  %v326_v43 = vld [vmem:[%s1743_s1 + $0x70] sm:$0xff] }
  0x19   :  { %1083 = vmatmul.mubr.msk.f32.gmra.mrb[8].mxu1 %vm54_vm0, %v42_v31  ;;  %1067 = vmatprep.mubr.msk.f32.mxu0 %vm54_vm0, %v31_v32  ;;  %v327_v42 = vld [vmem:[%s1743_s1 + $0x78] sm:$0xff]  ;;  %v329_v44 = vld [vmem:[%s1743_s1 + $0x88] sm:$0xff]  ;;  %v328_v45 = vld [vmem:[%s1743_s1 + $0x80] sm:$0xff] }
  0x1a   :  { %1085 = vmatprep.mubr.msk.f32.mxu1 %vm54_vm0, %v43_v33  ;;  %v331_v46 = vld [vmem:[%s1743_s1 + $0x98] sm:$0xff]  ;;  %v330_v47 = vld [vmem:[%s1743_s1 + $0x90] sm:$0xff]  ;;  %v333_v48 = vld [vmem:[%s1743_s1 + $0xa8] sm:$0xff] }
  0x1b   :  { %527 = vperm.xlu1 %1100, %v321_v34   ;;  %522 = vperm.xlu0 %1099, %v320_v35   ;;  %v332_v49 = vld [vmem:[%s1743_s1 + $0xa0] sm:$0xff]  ;;  %v335_v50 = vld [vmem:[%s1743_s1 + $0xb8] sm:$0xff]  ;;  %v334_v51 = vld [vmem:[%s1743_s1 + $0xb0] sm:$0xff]  ;;  %s1270_s1 = smov 96  }
  0x1c   :  { %1068 = vmatmul.mubr.msk.f32.gmra.mrb[10].mxu0 %vm54_vm0, %v32_v36  ;;  %v1495_v59 = vld [vmem:[%s1746_s4] ss:$0 sm:$0xff] }
  0x1d   :  { %1086 = vmatmul.mubr.msk.f32.gmra.mrb[10].mxu1 %vm54_vm0, %v44_v37 }
  0x1f   :  { %537 = vperm.xlu1 %1100, %v323_v38   ;;  %532 = vperm.xlu0 %1099, %v322_v39  }
  0x23   :  { %547 = vperm.xlu1 %1100, %v325_v40   ;;  %542 = vperm.xlu0 %1099, %v324_v41  }
  0x27   :  { %557 = vperm.xlu1 %1100, %v327_v42   ;;  %552 = vperm.xlu0 %1099, %v326_v43  }
  0x2b   :  { %567 = vperm.xlu1 %1100, %v329_v44   ;;  %562 = vperm.xlu0 %1099, %v328_v45  }
  0x2f   :  { %577 = vperm.xlu1 %1100, %v331_v46   ;;  %572 = vperm.xlu0 %1099, %v330_v47  }
  0x33   :  { %587 = vperm.xlu1 %1100, %v333_v48   ;;  %582 = vperm.xlu0 %1099, %v332_v49  }
  0x37   :  { %597 = vperm.xlu1 %1100, %v335_v50   ;;  %592 = vperm.xlu0 %1099, %v334_v51  }
  0x85   :  { %v1478_v52 = vpop.permute.xlu1 %492 }
  0x86   :  { %v1480_v53 = vpop.permute.xlu0 %482 }
  0x89   :  { %v1482_v54 = vpop.permute.xlu1 %497 }
  0x8a   :  { %v1484_v55 = vpop.permute.xlu0 %487 }
  0x92   :  { %v1486_v56 = vpop.permute.xlu1 %507  ;;  %v1488_v57 = vpop.permute.xlu0 %502 }
  0x96   :  { %v1490_v58 = vpop.permute.xlu1 %517  ;;  %v1497_v60 = vpop.permute.xlu0 %512 }
  0x9a   :  { %v1503_v5 = vpop.permute.xlu1 %527  ;;  %v1507_v16 = vpop.permute.xlu0 %522 }
  0x9e   :  { %v1513_v25 = vpop.permute.xlu1 %537  ;;  %v1524_v36 = vpop.permute.xlu0 %532 }
  0xa2   :  { %v1527_v39 = vpop.permute.xlu1 %547 }
  0xdb   :  { %v1054_v61 = vpop.f32.mrb[0].mxu0 }
  0xdc   :  { %v1072_v62 = vpop.f32.mrb[0].mxu1  ;;  %v199_v63 = vadd.f32 %v1054_v61, %v1495_v59  ;;  %v193_v1 = vpop.f32.mrb[1].mxu0 }
  0xdd   :  { %v259_v0 = vadd.f32 %v1072_v62, %v1495_v59  ;;  %v253_v2 = vpop.f32.mrb[1].mxu1  ;;  %v194_v3 = vadd.f32 %v1495_v59, %v193_v1 }
  0xde   :  { %v254_v4 = vadd.f32 %v1495_v59, %v253_v2  ;;  %v999_v6 = vmul.f32 -1.442695, %v199_v63  ;;  %1101 = vtanh.f32 %v199_v63 }
  0xdf   :  { %v1011_v7 = vmul.f32 -1.442695, %v259_v0  ;;  %1103 = vtanh.f32 %v259_v0  ;;  %v998_v8 = vmul.f32 -1.442695, %v194_v3  ;;  %v1057_v9 = vpop.f32.mrb[2].mxu0 }
  0xe0   :  { %v1075_v10 = vpop.f32.mrb[2].mxu1  ;;  %1105 = vpow2.f32 %v999_v6  ;;  %v1010_v11 = vmul.f32 -1.442695, %v254_v4  ;;  %v209_v12 = vadd.f32 %v1057_v9, %v1495_v59  ;;  %v203_v14 = vpop.f32.mrb[3].mxu0 }
  0xe1   :  { %v269_v13 = vadd.f32 %v1075_v10, %v1495_v59  ;;  %v263_v15 = vpop.f32.mrb[3].mxu1  ;;  %1107 = vpow2.f32 %v1011_v7  ;;  %v204_v18 = vadd.f32 %v1495_v59, %v203_v14  ;;  %v543_v7 = vpop.permute.xlu0 %542 }
  0xe2   :  { %1109 = vpow2.f32 %v998_v8  ;;  %v1001_v17 = vmul.f32 -1.442695, %v209_v12  ;;  %v264_v22 = vadd.f32 %v1495_v59, %v263_v15 }
  0xe3   :  { %1111 = vtanh.f32 %v194_v3  ;;  %v1060_v19 = vpop.f32.mrb[4].mxu0  ;;  %v1013_v21 = vmul.f32 -1.442695, %v269_v13  ;;  %v1000_v26 = vmul.f32 -1.442695, %v204_v18 }
  0xe4   :  { %v1078_v20 = vpop.f32.mrb[4].mxu1  ;;  %1113 = vpow2.f32 %v1010_v11  ;;  %v213_v23 = vpop.f32.mrb[5].mxu0  ;;  %v1012_v30 = vmul.f32 -1.442695, %v264_v22  ;;  %v219_v37 = vadd.f32 %v1060_v19, %v1495_v59 }
  0xe5   :  { %v1511_v24 = vpop.f32.mrb[5].mxu1  ;;  %1115 = vtanh.f32 %v254_v4  ;;  %v1540_v61 = vadd.f32 %v1078_v20, %v1495_v59  ;;  %v214_v9 = vadd.f32 %v1495_v59, %v213_v23 }
  0xe6   :  { %1117 = vpow2.f32 %v1001_v17  ;;  %v1003_v51 = vmul.f32 -1.442695, %v219_v37  ;;  %v1558_v19 = vadd.f32 %v1495_v59, %v1511_v24 }
  0xe7   :  { %1119 = vtanh.f32 %v209_v12  ;;  %v1515_v27 = vpop.f32.mrb[6].mxu0  ;;  %v1015_v12 = vmul.f32 -1.442695, %v1540_v61  ;;  %v1002_v23 = vmul.f32 -1.442695, %v214_v9 }
  0xe8   :  { %v1517_v28 = vpop.f32.mrb[6].mxu1  ;;  %v1102_v29 = vpop.eup %1101  ;;  %1121 = vpow2.f32 %v1013_v21 }
  0xe9   :  { %v1519_v31 = vpop.f32.mrb[7].mxu0  ;;  %v1521_v32 = vpop.f32.mrb[7].mxu1  ;;  %1123 = vtanh.f32 %v269_v13  ;;  %v674_v34 = vmul.f32 %v1102_v29, %v1484_v55  ;;  %v229_v29 = vadd.f32 %v1515_v27, %v1495_v59  ;;  %v1572_v27 = vadd.f32 %v1517_v28, %v1495_v59 }
  0xea   :  { %v1104_v33 = vpop.eup %1103  ;;  %1125 = vpow2.f32 %v1000_v26  ;;  %v558_v21 = vpop.permute.xlu1 %557  ;;  %v224_v28 = vadd.f32 %v1495_v59, %v1519_v31 }
  0xeb   :  { %v1106_v35 = vpop.eup %1105  ;;  %1127 = vtanh.f32 %v204_v18  ;;  %723 = vrot.lane.b32.xlu1 %v674_v34, %s1270_s1  ;;  %v1532_v44 = vpop.f32.mrb[8].mxu0  ;;  %v686_v49 = vmul.f32 %v1104_v33, %v1527_v39 }
  0xec   :  { %v1108_v38 = vpop.eup %1107  ;;  %v409_v40 = vadd.f32 1.0, %v1106_v35  ;;  %v1529_v41 = vpop.f32.mrb[8].mxu1  ;;  %1129 = vpow2.f32 %v1012_v30 }
  0xed   :  { %v1110_v42 = vpop.eup %1109  ;;  %v421_v43 = vadd.f32 1.0, %v1108_v38  ;;  %v1534_v45 = vpop.f32.mrb[9].mxu1  ;;  %v1014_v38 = vmul.f32 -1.442695, %v1558_v19 }
  0xee   :  { %v1112_v46 = vpop.eup %1111  ;;  %1131 = vrcp.f32 %v409_v40  ;;  %v408_v47 = vadd.f32 1.0, %v1110_v42  ;;  %v1536_v48 = vpop.f32.mrb[9].mxu0 }
  0xef   :  { %v1114_v50 = vpop.eup %1113  ;;  %1133 = vrcp.f32 %v421_v43  ;;  %v673_v62 = vmul.f32 %v1112_v46, %v1480_v53  ;;  %747 = vrot.lane.b32.xlu1 %v686_v49, %s1270_s1  ;;  %v1547_v3 = vpop.f32.mrb[10].mxu0 }
  0xf0   :  { %v1116_v63 = vpop.eup %1115  ;;  %1135 = vrcp.f32 %v408_v47  ;;  %v420_v0 = vadd.f32 1.0, %v1114_v50  ;;  %v1543_v1 = vpop.f32.mrb[10].mxu1  ;;  %v1005_v47 = vmul.f32 -1.442695, %v229_v29 }
  0xf1   :  { %v1118_v2 = vpop.eup %1117  ;;  %1137 = vtanh.f32 %v264_v22  ;;  %721 = vrot.lane.b32.xlu0 %v673_v62, %s1270_s1  ;;  %v1549_v4 = vpop.f32.mrb[11].mxu1  ;;  %v685_v13 = vmul.f32 %v1116_v63, %v543_v7 }
  0xf2   :  { %v1120_v6 = vpop.eup %1119  ;;  %1139 = vrcp.f32 %v420_v0  ;;  %v411_v8 = vadd.f32 1.0, %v1118_v2  ;;  %v1552_v10 = vpop.f32.mrb[11].mxu0  ;;  %v1017_v0 = vmul.f32 -1.442695, %v1572_v27 }
  0xf3   :  { %v1122_v11 = vpop.eup %1121  ;;  %1141 = vpow2.f32 %v1003_v51  ;;  %v676_v14 = vmul.f32 %v1120_v6, %v1482_v54  ;;  %v553_v46 = vpop.permute.xlu0 %552  ;;  %v1586_v6 = vadd.f32 %v1495_v59, %v1521_v32 }
  0xf4   :  { %v1124_v15 = vpop.eup %1123  ;;  %1143 = vrcp.f32 %v411_v8  ;;  %v423_v17 = vadd.f32 1.0, %v1122_v11  ;;  %v1004_v11 = vmul.f32 -1.442695, %v224_v28 }
  0xf5   :  { %v1126_v18 = vpop.eup %1125  ;;  %1145 = vtanh.f32 %v219_v37  ;;  %745 = vrot.lane.b32.xlu0 %v685_v13, %s1270_s1  ;;  %727 = vrot.lane.b32.xlu1 %v676_v14, %s1270_s1  ;;  %v688_v33 = vmul.f32 %v1124_v15, %v558_v21  ;;  %v1016_v32 = vmul.f32 -1.442695, %v1586_v6  ;;  %v1596_v14 = vadd.f32 %v1529_v41, %v1495_v59 }
  0xf6   :  { %v1128_v20 = vpop.eup %1127  ;;  %1147 = vrcp.f32 %v423_v17  ;;  %v410_v22 = vadd.f32 1.0, %v1126_v18 }
  0xf7   :  { %v1130_v26 = vpop.eup %1129  ;;  %1149 = vpow2.f32 %v1015_v12  ;;  %v675_v30 = vmul.f32 %v1128_v20, %v1478_v52  ;;  %v1019_v41 = vmul.f32 -1.442695, %v1596_v14 }
  0xf8   :  { %v1132_v34 = vpop.eup %1131  ;;  %1151 = vrcp.f32 %v410_v22  ;;  %v422_v24 = vadd.f32 1.0, %v1130_v26  ;;  %v239_v22 = vadd.f32 %v1532_v44, %v1495_v59 }
  0xf9   :  { %v1134_v35 = vpop.eup %1133  ;;  %v601_v37 = vmul.f32 %v1132_v34, %v1484_v55  ;;  %725 = vrot.lane.b32.xlu0 %v675_v30, %s1270_s1  ;;  %751 = vrot.lane.b32.xlu1 %v688_v33, %s1270_s1  ;;  %v234_v30 = vadd.f32 %v1495_v59, %v1536_v48  ;;  %v1612_v48 = vadd.f32 %v1495_v59, %v1534_v45 }
  0xfa   :  { %v1136_v40 = vpop.eup %1135  ;;  %v613_v42 = vmul.f32 %v1134_v35, %v1527_v39  ;;  %1153 = vrcp.f32 %v422_v24  ;;  %v1007_v44 = vmul.f32 -1.442695, %v239_v22 }
  0xfb   :  { %v1138_v43 = vpop.eup %1137  ;;  %626 = vst.msk [vmem:[#allocation2 + $0x8] sm:$0xff] %vm624_vm1, %v601_v37  ;;  %v600_v55 = vmul.f32 %v1136_v40, %v1480_v53  ;;  %1155 = vpow2.f32 %v1002_v23  ;;  %v1018_v45 = vmul.f32 -1.442695, %v1612_v48 }
  0xfc   :  { %v1140_v49 = vpop.eup %1139  ;;  %638 = vst.msk [vmem:[#allocation2 + $0x68] sm:$0xff] %vm624_vm1, %v613_v42  ;;  %1157 = vtanh.f32 %v214_v9  ;;  %v687_v50 = vmul.f32 %v1138_v43, %v553_v46  ;;  %v1006_v42 = vmul.f32 -1.442695, %v234_v30 }
  0xfd   :  { %v1142_v51 = vpop.eup %1141  ;;  %625 = vst.msk [vmem:[#allocation2] sm:$0xff] %vm624_vm1, %v600_v55  ;;  %v612_v39 = vmul.f32 %v1140_v49, %v543_v7  ;;  %1159 = vpow2.f32 %v1014_v38 }
  0xfe   :  { %v1144_v62 = vpop.eup %1143  ;;  %v413_v63 = vadd.f32 1.0, %v1142_v51  ;;  %749 = vrot.lane.b32.xlu0 %v687_v50, %s1270_s1  ;;  %1161 = vpow2.f32 %v1005_v47  ;;  %v1620_v47 = vadd.f32 %v1543_v1, %v1495_v59 }
  0xff   :  { %v1146_v53 = vpop.eup %1145  ;;  %637 = vst.msk [vmem:[#allocation2 + $0x60] sm:$0xff] %vm624_vm1, %v612_v39  ;;  %v603_v2 = vmul.f32 %v1144_v62, %v1482_v54 }
 0x100   :  { %v1148_v7 = vpop.eup %1147  ;;  %1163 = vrcp.f32 %v413_v63  ;;  %v678_v31 = vmul.f32 %v1146_v53, %v1486_v56  ;;  %v249_v63 = vadd.f32 %v1547_v3, %v1495_v59  ;;  %v244_v3 = vadd.f32 %v1495_v59, %v1552_v10 }
 0x101   :  { %v1150_v8 = vpop.eup %1149  ;;  %628 = vst.msk [vmem:[#allocation2 + $0x18] sm:$0xff] %vm624_vm1, %v603_v2  ;;  %v615_v9 = vmul.f32 %v1148_v7, %v558_v21  ;;  %1165 = vtanh.f32 %v229_v29  ;;  %v1630_v2 = vpop.permute.xlu0 %562 }
 0x102   :  { %v1152_v12 = vpop.eup %1151  ;;  %v425_v13 = vadd.f32 1.0, %v1150_v8  ;;  %1167 = vpow2.f32 %v1017_v0  ;;  %731 = vrot.lane.b32.xlu1 %v678_v31, %s1270_s1  ;;  %v1021_v0 = vmul.f32 -1.442695, %v1620_v47  ;;  %v1008_v10 = vmul.f32 -1.442695, %v244_v3 }
 0x103   :  { %640 = vst.msk [vmem:[#allocation2 + $0x78] sm:$0xff] %vm624_vm1, %v615_v9  ;;  %v602_v54 = vmul.f32 %v1152_v12, %v1478_v52  ;;  %v1009_v9 = vmul.f32 -1.442695, %v249_v63 }
 0x104   :  { %v1154_v15 = vpop.eup %1153  ;;  %1169 = vrcp.f32 %v425_v13  ;;  %v1641_v13 = vadd.f32 %v1495_v59, %v1549_v4 }
 0x105   :  { %v1156_v17 = vpop.eup %1155  ;;  %627 = vst.msk [vmem:[#allocation2 + $0x10] sm:$0xff] %vm624_vm1, %v602_v54  ;;  %v614_v18 = vmul.f32 %v1154_v15, %v553_v46  ;;  %1171 = vpow2.f32 %v1004_v11  ;;  %v1614_v46 = vpop.permute.xlu1 %567 }
 0x106   :  { %v1158_v20 = vpop.eup %1157  ;;  %v412_v21 = vadd.f32 1.0, %v1156_v17  ;;  %1173 = vtanh.f32 %v224_v28  ;;  %v1020_v4 = vmul.f32 -1.442695, %v1641_v13 }
 0x107   :  { %v1160_v52 = vpop.eup %1159  ;;  %639 = vst.msk [vmem:[#allocation2 + $0x70] sm:$0xff] %vm624_vm1, %v614_v18  ;;  %1175 = vpow2.f32 %v1016_v32  ;;  %v677_v23 = vmul.f32 %v1158_v20, %v1488_v57 }
 0x108   :  { %1177 = vrcp.f32 %v412_v21  ;;  %v424_v26 = vadd.f32 1.0, %v1160_v52  ;;  %v1162_v29 = vpop.eup %1161  ;;  %v1653_v52 = vpop.permute.xlu0 %572 }
 0x109   :  { %729 = vrot.lane.b32.xlu0 %v677_v23, %s1270_s1  ;;  %v415_v34 = vadd.f32 1.0, %v1162_v29  ;;  %v1643_v32 = vpop.permute.xlu1 %577 }
 0x10a   :  { %v1164_v33 = vpop.eup %1163  ;;  %1179 = vrcp.f32 %v424_v26 }
 0x10b   :  { %v1166_v24 = vpop.eup %1165  ;;  %v605_v35 = vmul.f32 %v1164_v33, %v1486_v56  ;;  %1181 = vpow2.f32 %v1019_v41 }
 0x10c   :  { %v1168_v37 = vpop.eup %1167  ;;  %1183 = vrcp.f32 %v415_v34  ;;  %v680_v38 = vmul.f32 %v1166_v24, %v1490_v58 }
 0x10d   :  { %630 = vst.msk [vmem:[#allocation2 + $0x28] sm:$0xff] %vm624_vm1, %v605_v35  ;;  %v427_v40 = vadd.f32 1.0, %v1168_v37  ;;  %1185 = vpow2.f32 %v1007_v44  ;;  %v588_v34 = vpop.permute.xlu1 %587 }
 0x10e   :  { %v1170_v43 = vpop.eup %1169  ;;  %735 = vrot.lane.b32.xlu1 %v680_v38, %s1270_s1 }
 0x10f   :  { %v1172_v56 = vpop.eup %1171  ;;  %v617_v55 = vmul.f32 %v1170_v43, %v1614_v46  ;;  %1187 = vrcp.f32 %v427_v40 }
 0x110   :  { %v1174_v49 = vpop.eup %1173  ;;  %v414_v50 = vadd.f32 1.0, %v1172_v56  ;;  %1189 = vtanh.f32 %v239_v22 }
 0x111   :  { %v1176_v51 = vpop.eup %1175  ;;  %642 = vst.msk [vmem:[#allocation2 + $0x88] sm:$0xff] %vm624_vm1, %v617_v55  ;;  %1191 = vpow2.f32 %v1006_v42  ;;  %v679_v39 = vmul.f32 %v1174_v49, %v1497_v60 }
 0x112   :  { %v1178_v28 = vpop.eup %1177  ;;  %1193 = vrcp.f32 %v414_v50  ;;  %v426_v62 = vadd.f32 1.0, %v1176_v51 }
 0x113   :  { %v604_v1 = vmul.f32 %v1178_v28, %v1488_v57  ;;  %1195 = vtanh.f32 %v234_v30  ;;  %733 = vrot.lane.b32.xlu0 %v679_v39, %s1270_s1 }
 0x114   :  { %v1180_v53 = vpop.eup %1179  ;;  %1197 = vrcp.f32 %v426_v62  ;;  %v598_v62 = vpop.permute.xlu1 %597 }
 0x115   :  { %v1182_v7 = vpop.eup %1181  ;;  %629 = vst.msk [vmem:[#allocation2 + $0x20] sm:$0xff] %vm624_vm1, %v604_v1  ;;  %v616_v31 = vmul.f32 %v1180_v53, %v1630_v2  ;;  %1199 = vpow2.f32 %v1018_v45 }
 0x116   :  { %v1184_v8 = vpop.eup %1183  ;;  %1201 = vtanh.f32 %v1540_v61  ;;  %v429_v57 = vadd.f32 1.0, %v1182_v7 }
 0x117   :  { %641 = vst.msk [vmem:[#allocation2 + $0x80] sm:$0xff] %vm624_vm1, %v616_v31  ;;  %v607_v11 = vmul.f32 %v1184_v8, %v1490_v58  ;;  %1203 = vpow2.f32 %v1021_v0  ;;  %v1186_v12 = vpop.eup %1185 }
 0x118   :  { %1205 = vrcp.f32 %v429_v57  ;;  %v417_v61 = vadd.f32 1.0, %v1186_v12 }
 0x119   :  { %v1188_v54 = vpop.eup %1187  ;;  %1207 = vtanh.f32 %v1558_v19  ;;  %632 = vst.msk [vmem:[#allocation2 + $0x38] sm:$0xff] %vm624_vm1, %v607_v11 }
 0x11a   :  { %v1190_v15 = vpop.eup %1189  ;;  %v619_v17 = vmul.f32 %v1188_v54, %v1643_v32  ;;  %1209 = vpow2.f32 %v1009_v9 }
 0x11b   :  { %v1192_v58 = vpop.eup %1191  ;;  %1211 = vrcp.f32 %v417_v61  ;;  %v682_v18 = vmul.f32 %v1190_v15, %v1503_v5 }
 0x11c   :  { %v1194_v20 = vpop.eup %1193  ;;  %644 = vst.msk [vmem:[#allocation2 + $0x98] sm:$0xff] %vm624_vm1, %v619_v17  ;;  %v416_v59 = vadd.f32 1.0, %v1192_v58  ;;  %1213 = vtanh.f32 %v249_v63 }
 0x11d   :  { %v1196_v19 = vpop.eup %1195  ;;  %v606_v21 = vmul.f32 %v1194_v20, %v1497_v60  ;;  %1215 = vpow2.f32 %v1008_v10  ;;  %739 = vrot.lane.b32.xlu1 %v682_v18, %s1270_s1 }
 0x11e   :  { %v1198_v22 = vpop.eup %1197  ;;  %1217 = vrcp.f32 %v416_v59  ;;  %v681_v41 = vmul.f32 %v1196_v19, %v1507_v16 }
 0x11f   :  { %v1200_v23 = vpop.eup %1199  ;;  %631 = vst.msk [vmem:[#allocation2 + $0x30] sm:$0xff] %vm624_vm1, %v606_v21  ;;  %v618_v26 = vmul.f32 %v1198_v22, %v1653_v52  ;;  %1219 = vtanh.f32 %v244_v3  ;;  %v820_v21 = vld [vmem:[#allocation2] sm:$0xff] }
 0x120   :  { %v1202_v29 = vpop.eup %1201  ;;  %v428_v30 = vadd.f32 1.0, %v1200_v23  ;;  %1221 = vpow2.f32 %v1020_v4  ;;  %737 = vrot.lane.b32.xlu0 %v681_v41, %s1270_s1  ;;  %v817_v41 = vld [vmem:[%s1744_s2] sm:$0xff] }
 0x121   :  { %v1204_v60 = vpop.eup %1203  ;;  %1223 = vtanh.f32 %v1572_v27  ;;  %643 = vst.msk [vmem:[#allocation2 + $0x90] sm:$0xff] %vm624_vm1, %v618_v26  ;;  %v690_v39 = vmul.f32 %v1202_v29, %v1614_v46 }
 0x122   :  { %v1206_v33 = vpop.eup %1205  ;;  %1225 = vrcp.f32 %v428_v30  ;;  %v431_v44 = vadd.f32 1.0, %v1204_v60  ;;  %v836_v30 = vld [vmem:[#allocation2 + $0x18] sm:$0xff] }
 0x123   :  { %v1208_v24 = vpop.eup %1207  ;;  %v621_v35 = vmul.f32 %v1206_v33, %v588_v34 }
 0x124   :  { %v1210_v37 = vpop.eup %1209  ;;  %1227 = vrcp.f32 %v431_v44  ;;  %v689_v63 = vmul.f32 %v1208_v24, %v1630_v2  ;;  %v822_v24 = vld [vmem:[#allocation2 + $0x10] sm:$0xff] }
 0x125   :  { %v1212_v38 = vpop.eup %1211  ;;  %1229 = vtanh.f32 %v1586_v6  ;;  %646 = vst.msk [vmem:[#allocation2 + $0xa8] sm:$0xff] %vm624_vm1, %v621_v35  ;;  %v419_v40 = vadd.f32 1.0, %v1210_v37 }
 0x126   :  { %v1214_v42 = vpop.eup %1213  ;;  %1231 = vtanh.f32 %v1596_v14  ;;  %v609_v27 = vmul.f32 %v1212_v38, %v1503_v5  ;;  %v853_v37 = vld [vmem:[#allocation2 + $0x30] sm:$0xff]  ;;  %v821_v38 = vld [vmem:[#allocation2 + $0x8] sm:$0xff] }
 0x127   :  { %v1216_v43 = vpop.eup %1215  ;;  %1233 = vrcp.f32 %v419_v40  ;;  %v684_v56 = vmul.f32 %v1214_v42, %v1513_v25  ;;  %v825_v42 = vsub.f32 1.0, %v822_v24 }
 0x128   :  { %v1218_v55 = vpop.eup %1217  ;;  %634 = vst.msk [vmem:[#allocation2 + $0x48] sm:$0xff] %vm624_vm1, %v609_v27  ;;  %1235 = vtanh.f32 %v1612_v48  ;;  %v418_v49 = vadd.f32 1.0, %v1216_v43  ;;  %v583_v48 = vpop.permute.xlu0 %582  ;;  %v819_v27 = vld [vmem:[%s1744_s2 + $0x10] sm:$0xff]  ;;  %v856_v43 = vsub.f32 1.0, %v853_v37 }
 0x129   :  { %v1220_v50 = vpop.eup %1219  ;;  %v608_v6 = vmul.f32 %v1218_v55, %v1507_v16  ;;  %1237 = vtanh.f32 %v1620_v47  ;;  %743 = vrot.lane.b32.xlu1 %v684_v56, %s1270_s1  ;;  %v824_v56 = vsub.f32 1.0, %v821_v38  ;;  %v888_v38 = vld [vmem:[#allocation2 + $0x68] sm:$0xff] }
 0x12a   :  { %v1222_v14 = vpop.eup %1221  ;;  %1239 = vrcp.f32 %v418_v49  ;;  %v683_v5 = vmul.f32 %v1220_v50, %v1524_v36  ;;  %v818_v50 = vld [vmem:[%s1744_s2 + $0x8] sm:$0xff]  ;;  %s1271_s2 = smov [#allocation4]  }
 0x12b   :  { %v1224_v51 = vpop.eup %1223  ;;  %633 = vst.msk [vmem:[#allocation2 + $0x40] sm:$0xff] %vm624_vm1, %v608_v6  ;;  %v430_v45 = vadd.f32 1.0, %v1222_v14  ;;  %1241 = vtanh.f32 %v1641_v13  ;;  %v828_v6 = vmul.f32 %v825_v42, %v819_v27  ;;  %v906_v27 = vld [vmem:[#allocation2 + $0x88] sm:$0xff]  ;;  %s962_s19 = sshll.u32 %s1271_s2, 4  ;;  %s963_s19 = int_to_ptr.vmem [resolvable:$true] %s962_s19 }
 0x12c   :  { %v1226_v28 = vpop.eup %1225  ;;  %741 = vrot.lane.b32.xlu0 %v683_v5, %s1270_s1  ;;  %v692_v46 = vmul.f32 %v1224_v51, %v1643_v32  ;;  %v593_v32 = vpop.permute.xlu0 %592  ;;  %v838_v5 = vld [vmem:[#allocation2 + $0x28] sm:$0xff]  ;;  %s1245_s20 = scalar_lea.vmem %s963_s19, 384  ;;  %p1250_p1 = scmp.lt.s32.totalorder %s963_s19, %s963_s19 }
 0x12d   :  { %v620_v16 = vmul.f32 %v1226_v28, %v583_v48  ;;  %1243 = vrcp.f32 %v430_v45  ;;  %755 = vrot.lane.b32.xlu1 %v690_v39, %s1270_s1  ;;  %p1246_p0 = scmp.ne.s32.totalorder %s963_s19, %s1245_s20  ;;  %p1251_p2 = scmp.lt.s32.totalorder %s1245_s20, %s1245_s20 }
 0x12e   :  { %v1228_v47 = vpop.eup %1227 }
 0x12f   :  { %v1230_v1 = vpop.eup %1229  ;;  %645 = vst.msk [vmem:[#allocation2 + $0xa0] sm:$0xff] %vm624_vm1, %v620_v16  ;;  %v623_v0 = vmul.f32 %v1228_v47, %v598_v62  ;;  %v870_v45 = vld [vmem:[#allocation2 + $0x48] sm:$0xff]  ;;  %v827_v16 = vmul.f32 %v824_v56, %v818_v50  ;;  %v841_v47 = vsub.f32 1.0, %v838_v5  ;;  %v921_v50 = vld [vmem:[#allocation2 + $0x90] sm:$0xff]  ;;  %v891_v5 = vsub.f32 1.0, %v888_v38  ;;  %p1252_p3 = por %p1251_p2, %p1250_p1 }
 0x130   :  { %v1232_v53 = vpop.eup %1231  ;;  %753 = vrot.lane.b32.xlu0 %v689_v63, %s1270_s1  ;;  %v691_v8 = vmul.f32 %v1230_v1, %v1653_v52  ;;  %v823_v52 = vsub.f32 1.0, %v820_v21  ;;  %v873_v1 = vsub.f32 1.0, %v870_v45 }
 0x131   :  { %v1234_v7 = vpop.eup %1233  ;;  %648 = vst.msk [vmem:[#allocation2 + $0xb8] sm:$0xff] %vm624_vm1, %v623_v0  ;;  %759 = vrot.lane.b32.xlu1 %v692_v46, %s1270_s1  ;;  %v694_v57 = vmul.f32 %v1232_v53, %v588_v34  ;;  %v839_v34 = vsub.f32 1.0, %v836_v30  ;;  %v889_v30 = vld [vmem:[#allocation2 + $0x70] sm:$0xff]  ;;  %p1253_p4 = pnand %p1252_p3, %p1246_p0 }
 0x132   :  { %v1236_v31 = vpop.eup %1235  ;;  %v611_v3 = vmul.f32 %v1234_v7, %v1513_v25  ;;  %v826_v29 = vmul.f32 %v823_v52, %v817_v41 }
 0x133   :  { %v1238_v2 = vpop.eup %1237  ;;  %v693_v13 = vmul.f32 %v1236_v31, %v583_v48 }
 0x134   :  { %v1240_v9 = vpop.eup %1239  ;;  %636 = vst.msk [vmem:[#allocation2 + $0x58] sm:$0xff] %vm624_vm1, %v611_v3  ;;  %757 = vrot.lane.b32.xlu0 %v691_v8, %s1270_s1  ;;  %v696_v25 = vmul.f32 %v1238_v2, %v598_v62  ;;  %v837_v62 = vld [vmem:[#allocation2 + $0x20] sm:$0xff] }
 0x135   :  { %v610_v11 = vmul.f32 %v1240_v9, %v1524_v36  ;;  %763 = vrot.lane.b32.xlu1 %v694_v57, %s1270_s1  ;;  %v1242_v12 = vpop.eup %1241  ;;  %v840_v31 = vsub.f32 1.0, %v837_v62  ;;  %v855_v3 = vld [vmem:[#allocation2 + $0x40] sm:$0xff] }
 0x136   :  { %v695_v10 = vmul.f32 %v1242_v12, %v593_v32  ;;  %v887_v57 = vld [vmem:[#allocation2 + $0x60] sm:$0xff]  ;;  %v854_v12 = vld [vmem:[#allocation2 + $0x38] sm:$0xff] }
 0x137   :  { %v1244_v54 = vpop.eup %1243  ;;  %635 = vst.msk [vmem:[#allocation2 + $0x50] sm:$0xff] %vm624_vm1, %v610_v11 }
 0x138   :  { %v622_v61 = vmul.f32 %v1244_v54, %v593_v32  ;;  %761 = vrot.lane.b32.xlu0 %v693_v13, %s1270_s1  ;;  %v858_v13 = vsub.f32 1.0, %v855_v3  ;;  %v922_v3 = vld [vmem:[#allocation2 + $0x98] sm:$0xff] }
 0x139   :  { %767 = vrot.lane.b32.xlu1 %v696_v25, %s1270_s1  ;;  %v890_v25 = vsub.f32 1.0, %v887_v57  ;;  %v938_v57 = vld [vmem:[#allocation2 + $0xa8] sm:$0xff] }
 0x13a   :  { %647 = vst.msk [vmem:[#allocation2 + $0xb0] sm:$0xff] %vm624_vm1, %v622_v61 }
 0x13c   :  { %765 = vrot.lane.b32.xlu0 %v695_v10, %s1270_s1 }
 0x15d   :  { %v724_v36 = vpop.permute.xlu1 %723 }
 0x15e   :  { %794 = vst.msk [vmem:[#allocation3 + $0x8] sm:$0xff] %vm624_vm1, %v724_v36  ;;  %v857_v36 = vsub.f32 1.0, %v854_v12 }
 0x161   :  { %v748_v15 = vpop.permute.xlu1 %747 }
 0x162   :  { %806 = vst.msk [vmem:[#allocation3 + $0x68] sm:$0xff] %vm624_vm1, %v748_v15 }
 0x163   :  { %v722_v17 = vpop.permute.xlu0 %721 }
 0x164   :  { %793 = vst.msk [vmem:[#allocation3] sm:$0xff] %vm624_vm1, %v722_v17  ;;  %v872_v17 = vld [vmem:[#allocation2 + $0x58] sm:$0xff] }
 0x165   :  { %v830_v39 = vld [vmem:[#allocation3 + $0x8] sm:$0xff] }
 0x166   :  { %v833_v0 = vadd.f32 %v830_v39, %v827_v16 }
 0x167   :  { %v746_v58 = vpop.permute.xlu0 %745  ;;  %v728_v18 = vpop.permute.xlu1 %727 }
 0x168   :  { %805 = vst.msk [vmem:[#allocation3 + $0x60] sm:$0xff] %vm624_vm1, %v746_v58  ;;  %796 = vst.msk [vmem:[#allocation3 + $0x18] sm:$0xff] %vm624_vm1, %v728_v18  ;;  %v843_v9 = vmul.f32 %v840_v31, %v833_v0  ;;  %v923_v0 = vld [vmem:[#allocation2 + $0xa0] sm:$0xff] }
 0x16b   :  { %v726_v20 = vpop.permute.xlu0 %725  ;;  %v752_v59 = vpop.permute.xlu1 %751  ;;  %v829_v26 = vld [vmem:[#allocation3] sm:$0xff] }
 0x16c   :  { %795 = vst.msk [vmem:[#allocation3 + $0x10] sm:$0xff] %vm624_vm1, %v726_v20  ;;  %808 = vst.msk [vmem:[#allocation3 + $0x78] sm:$0xff] %vm624_vm1, %v752_v59  ;;  %v832_v60 = vadd.f32 %v829_v26, %v826_v29 }
 0x16e   :  { %v842_v35 = vmul.f32 %v839_v34, %v832_v60 }
 0x16f   :  { %v846_v44 = vld [vmem:[#allocation3 + $0x18] sm:$0xff]  ;;  %v897_v21 = vld [vmem:[#allocation3 + $0x60] sm:$0xff] }
 0x170   :  { %v750_v4 = vpop.permute.xlu0 %749  ;;  %v849_v40 = vadd.f32 %v846_v44, %v842_v35 }
 0x171   :  { %807 = vst.msk [vmem:[#allocation3 + $0x70] sm:$0xff] %vm624_vm1, %v750_v4 }
 0x172   :  { %v859_v14 = vmul.f32 %v856_v43, %v849_v40  ;;  %v892_v40 = vsub.f32 1.0, %v889_v30 }
 0x173   :  { %v831_v55 = vld [vmem:[#allocation3 + $0x10] sm:$0xff] }
 0x174   :  { %v732_v19 = vpop.permute.xlu1 %731  ;;  %v834_v28 = vadd.f32 %v831_v55, %v828_v6 }
 0x175   :  { %798 = vst.msk [vmem:[#allocation3 + $0x28] sm:$0xff] %vm624_vm1, %v732_v19  ;;  %v875_v19 = vsub.f32 1.0, %v872_v17  ;;  %v939_v17 = vld [vmem:[#allocation2 + $0xb0] sm:$0xff] }
 0x176   :  { %v844_v53 = vmul.f32 %v841_v47, %v834_v28  ;;  %v905_v28 = vld [vmem:[#allocation2 + $0x80] sm:$0xff]  ;;  %v924_v47 = vsub.f32 1.0, %v921_v50 }
 0x17b   :  { %v730_v22 = vpop.permute.xlu0 %729 }
 0x17c   :  { %797 = vst.msk [vmem:[#allocation3 + $0x20] sm:$0xff] %vm624_vm1, %v730_v22  ;;  %v848_v46 = vld [vmem:[#allocation3 + $0x28] sm:$0xff]  ;;  %v904_v22 = vld [vmem:[#allocation2 + $0x78] sm:$0xff] }
 0x17d   :  { %v851_v8 = vadd.f32 %v848_v46, %v844_v53  ;;  %v907_v60 = vsub.f32 1.0, %v904_v22 }
 0x17f   :  { %v861_v61 = vmul.f32 %v858_v13, %v851_v8 }
 0x180   :  { %v736_v23 = vpop.permute.xlu1 %735 }
 0x181   :  { %800 = vst.msk [vmem:[#allocation3 + $0x38] sm:$0xff] %vm624_vm1, %v736_v23  ;;  %v871_v23 = vld [vmem:[#allocation2 + $0x50] sm:$0xff] }
 0x182   :  { %v874_v44 = vsub.f32 1.0, %v871_v23 }
 0x183   :  { %v847_v2 = vld [vmem:[#allocation3 + $0x20] sm:$0xff] }
 0x184   :  { %v850_v32 = vadd.f32 %v847_v2, %v843_v9 }
 0x185   :  { %v734_v33 = vpop.permute.xlu0 %733 }
 0x186   :  { %799 = vst.msk [vmem:[#allocation3 + $0x30] sm:$0xff] %vm624_vm1, %v734_v33  ;;  %v860_v20 = vmul.f32 %v857_v36, %v850_v32  ;;  %v940_v36 = vld [vmem:[#allocation2 + $0xb8] sm:$0xff] }
 0x188   :  { %v864_v59 = vld [vmem:[#allocation3 + $0x38] sm:$0xff] }
 0x189   :  { %v867_v29 = vadd.f32 %v864_v59, %v860_v20 }
 0x18b   :  { %v877_v42 = vmul.f32 %v874_v44, %v867_v29 }
 0x18d   :  { %v863_v49 = vld [vmem:[#allocation3 + $0x30] sm:$0xff] }
 0x18e   :  { %v866_v48 = vadd.f32 %v863_v49, %v859_v14  ;;  %v914_v49 = vld [vmem:[#allocation3 + $0x78] sm:$0xff] }
 0x18f   :  { %v740_v51 = vpop.permute.xlu1 %739 }
 0x190   :  { %802 = vst.msk [vmem:[#allocation3 + $0x48] sm:$0xff] %vm624_vm1, %v740_v51  ;;  %v876_v7 = vmul.f32 %v873_v1, %v866_v48  ;;  %v899_v51 = vld [vmem:[#allocation3 + $0x70] sm:$0xff]  ;;  %v909_v48 = vsub.f32 1.0, %v906_v27 }
 0x192   :  { %v738_v63 = vpop.permute.xlu0 %737 }
 0x193   :  { %801 = vst.msk [vmem:[#allocation3 + $0x40] sm:$0xff] %vm624_vm1, %v738_v63  ;;  %v898_v63 = vld [vmem:[#allocation3 + $0x68] sm:$0xff] }
 0x197   :  { %v880_v11 = vld [vmem:[#allocation3 + $0x48] sm:$0xff] }
 0x198   :  { %v883_v54 = vadd.f32 %v880_v11, %v876_v7  ;;  %v908_v7 = vsub.f32 1.0, %v905_v28  ;;  %v926_v11 = vsub.f32 1.0, %v923_v0 }
 0x19a   :  { %v865_v10 = vld [vmem:[#allocation3 + $0x40] sm:$0xff]  ;;  %v893_v58 = vmul.f32 %v890_v25, %v883_v54  ;;  %v925_v54 = vsub.f32 1.0, %v922_v3 }
 0x19b   :  { %v744_v15 = vpop.permute.xlu1 %743  ;;  %v868_v18 = vadd.f32 %v865_v10, %v861_v61 }
 0x19c   :  { %804 = vst.msk [vmem:[#allocation3 + $0x58] sm:$0xff] %vm624_vm1, %v744_v15  ;;  %v900_v41 = vadd.f32 %v897_v21, %v893_v58  ;;  %v941_v15 = vsub.f32 1.0, %v938_v57 }
 0x19d   :  { %v878_v26 = vmul.f32 %v875_v19, %v868_v18  ;;  %v943_v19 = vsub.f32 1.0, %v940_v36 }
 0x19e   :  { %v742_v4 = vpop.permute.xlu0 %741  ;;  %v910_v35 = vmul.f32 %v907_v60, %v900_v41 }
 0x19f   :  { %803 = vst.msk [vmem:[#allocation3 + $0x50] sm:$0xff] %vm624_vm1, %v742_v4  ;;  %v756_v52 = vpop.permute.xlu1 %755 }
 0x1a0   :  { %810 = vst.msk [vmem:[#allocation3 + $0x88] sm:$0xff] %vm624_vm1, %v756_v52  ;;  %v917_v45 = vadd.f32 %v914_v49, %v910_v35  ;;  %v942_v52 = vsub.f32 1.0, %v939_v17 }
 0x1a2   :  { %v754_v33 = vpop.permute.xlu0 %753  ;;  %v927_v8 = vmul.f32 %v924_v47, %v917_v45 }
 0x1a3   :  { %809 = vst.msk [vmem:[#allocation3 + $0x80] sm:$0xff] %vm624_vm1, %v754_v33  ;;  %v760_v34 = vpop.permute.xlu1 %759  ;;  %v882_v24 = vld [vmem:[#allocation3 + $0x58] sm:$0xff] }
 0x1a4   :  { %812 = vst.msk [vmem:[#allocation3 + $0x98] sm:$0xff] %vm624_vm1, %v760_v34  ;;  %v885_v37 = vadd.f32 %v882_v24, %v878_v26 }
 0x1a6   :  { %v758_v43 = vpop.permute.xlu0 %757  ;;  %v881_v56 = vld [vmem:[#allocation3 + $0x50] sm:$0xff]  ;;  %v895_v55 = vmul.f32 %v892_v40, %v885_v37 }
 0x1a7   :  { %811 = vst.msk [vmem:[#allocation3 + $0x90] sm:$0xff] %vm624_vm1, %v758_v43  ;;  %v764_v6 = vpop.permute.xlu1 %763  ;;  %v884_v14 = vadd.f32 %v881_v56, %v877_v42  ;;  %v916_v31 = vld [vmem:[#allocation3 + $0x88] sm:$0xff] }
 0x1a8   :  { %814 = vst.msk [vmem:[#allocation3 + $0xa8] sm:$0xff] %vm624_vm1, %v764_v6  ;;  %v902_v39 = vadd.f32 %v899_v51, %v895_v55 }
 0x1a9   :  { %v894_v16 = vmul.f32 %v891_v5, %v884_v14 }
 0x1aa   :  { %v762_v62 = vpop.permute.xlu0 %761  ;;  %v912_v1 = vmul.f32 %v909_v48, %v902_v39  ;;  %v915_v13 = vld [vmem:[#allocation3 + $0x80] sm:$0xff] }
 0x1ab   :  { %813 = vst.msk [vmem:[#allocation3 + $0xa0] sm:$0xff] %vm624_vm1, %v762_v62  ;;  %v768_v46 = vpop.permute.xlu1 %767  ;;  %v901_v53 = vadd.f32 %v898_v63, %v894_v16  ;;  %v932_v59 = vld [vmem:[#allocation3 + $0x98] sm:$0xff] }
 0x1ac   :  { %816 = vst.msk [vmem:[#allocation3 + $0xb8] sm:$0xff] %vm624_vm1, %v768_v46  ;;  %v919_v2 = vadd.f32 %v916_v31, %v912_v1 }
 0x1ad   :  { %v911_v9 = vmul.f32 %v908_v7, %v901_v53 }
 0x1ae   :  { %v766_v12 = vpop.permute.xlu0 %765  ;;  %v931_v32 = vld [vmem:[#allocation3 + $0x90] sm:$0xff]  ;;  %v929_v61 = vmul.f32 %v926_v11, %v919_v2 }
 0x1af   :  { %815 = vst.msk [vmem:[#allocation3 + $0xb0] sm:$0xff] %vm624_vm1, %v766_v12  ;;  %v918_v25 = vadd.f32 %v915_v13, %v911_v9  ;;  %v934_v10 = vadd.f32 %v931_v32, %v927_v8  ;;  %v948_v58 = vld [vmem:[#allocation3 + $0xa8] sm:$0xff] }
 0x1b1   :  { %v928_v18 = vmul.f32 %v925_v54, %v918_v25  ;;  %v944_v20 = vmul.f32 %v941_v15, %v934_v10 }
 0x1b2   :  { %v933_v4 = vld [vmem:[#allocation3 + $0xa0] sm:$0xff] }
 0x1b3   :  { %v935_v21 = vadd.f32 %v932_v59, %v928_v18  ;;  %v936_v22 = vadd.f32 %v933_v4, %v929_v61  ;;  %v951_v41 = vadd.f32 %v948_v58, %v944_v20  ;;  %v950_v23 = vld [vmem:[#allocation3 + $0xb8] sm:$0xff] }
 0x1b5   :  { %v945_v26 = vmul.f32 %v942_v52, %v935_v21  ;;  %v946_v29 = vmul.f32 %v943_v19, %v936_v22  ;;  %954 = vst.msk [vmem:[#allocation4] sm:$0xff] %vm624_vm1, %v951_v41 }
 0x1b6   :  { %v949_v30 = vld [vmem:[#allocation3 + $0xb0] sm:$0xff] }
 0x1b7   :  { %v952_v60 = vadd.f32 %v949_v30, %v945_v26  ;;  %v953_v33 = vadd.f32 %v950_v23, %v946_v29 }
 0x1b9   :  { %955 = vst.msk [vmem:[#allocation4 + $0x8] sm:$0xff] %vm624_vm1, %v952_v60  ;;  %956 = vst.msk [vmem:[#allocation4 + $0x10] sm:$0xff] %vm624_vm1, %v953_v33 }
 0x1ba   :  { %1256 = shalt.err (!%p1253_p4)
}
 0x1bb   :  { %s1257_s23 = scalar_lea.hbm %s1747_s5, 384 }
 0x1bc   :  { %p1258_p5 = scmp.ne.s32.totalorder %s1747_s5, %s1257_s23  ;;  %p1261_p6 = scmp.lt.u32.totalorder %s1257_s23, %s1747_s5 }
 0x1be   :  { %p1263_p7 = pnand %p1261_p6, %p1258_p5 }
 0x1c0   :  { %1266 = shalt.err (!%p1263_p7)
}
 0x1c1   :  { %s1272_s27 = smov 128   ;;  %s1273_s28 = smov 8  }
 0x1c2   :  { %968 = dma.vmem_to_hbm [thread:$0]  %s963_s19, 384, %s1747_s5, [#allocation5], %s1272_s27, %s1272_s27, %s1273_s28  }
 0x1c3   :  { %1267 = dma.done.wait [#allocation5], 384  }
 0x1c4   :  { %1268 = vsyncadd [#allocation5], 4294966912 }
 0x1c5   :  { %972 = vsyncpa [#allocation5], 1 }

</bundles_post_ra>
